<compile_context>
chip_gen: v6e
topology: v6e:2x2x1
jax: 0.10.0
libtpu: 0.0.40
codegen_flags: <defaults>
</compile_context>

<pallas_src>
import math

import jax
import jax.numpy as jnp
from jax.experimental import pallas as pl
from jax.experimental.pallas import tpu as pltpu


def _zrelu_kernel(x_ref, o_ref):
    # Tile layout: lanes are interleaved [re, im, re, im, ...].
    x = x_ref[...]
    cb = x.shape[-1]  # static block width; always even (pairs never straddle)

    # Neighbour values along the lane axis (XLU rotations, non-negative shifts).
    left = pltpu.roll(x, 1, 1)        # lane i <- x[i - 1]
    right = pltpu.roll(x, cb - 1, 1)  # lane i <- x[i + 1]   (== shift of -1)

    # Even lanes hold real (partner at i + 1); odd lanes hold imag (partner at
    # i - 1).  Lane parity is block-offset invariant because block widths and
    # block column offsets are even.
    lane = jax.lax.broadcasted_iota(jnp.int32, x.shape, 1)
    partner = jnp.where((lane & 1) == 0, right, left)

    # First quadrant <=> 0 <= atan2(im, re) <= pi/2 <=> re >= 0 and im >= 0.
    keep = jnp.minimum(x, partner) >= 0
    o_ref[...] = jnp.where(keep, x, 0.0)


def _sublane_pack(dtype):
    """Rows per packed sublane group: 8 for f32, 16 for bf16/f16, 32 for int8."""
    itemsize = jnp.dtype(dtype).itemsize
    return 8 * max(1, 4 // itemsize)


def _hw_block_params():
    """(target_block_bytes, vmem_limit_bytes) tuned per TPU generation."""
    kind = ""
    try:
        kind = jax.devices()[0].device_kind.lower()
    except Exception:
        pass
    if "v7" in kind:
        # 3.2 TB/s HBM: amortize the ~0.35 us/grid-step cost with big blocks.
        # Footprint = 4 * block = 24 MiB -> above the 32 MiB scoped default,
        # so raise the limit explicitly (64 MiB physical VMEM per TC).
        return 6 * 1024 * 1024, 48 * 1024 * 1024
    if "v6" in kind:
        # 4 MiB blocks -> 16 MiB footprint, fits the 32 MiB scoped default.
        return 4 * 1024 * 1024, None
    # v5e (16 MiB scoped default) and unknown chips: 2 MiB -> 8 MiB footprint.
    return 2 * 1024 * 1024, None


def _fold_to_2d(shape, pack):
    """Pick an even-width (rows, cols) factorization of the flat element count.

    Reshape of a contiguous interleaved buffer is a zero-cost reinterpretation,
    so any factorization is fair game.  Preference order: rows a multiple of
    the sublane packing (no masked partial row tiles), cols a multiple of 256
    (pairs + lane parity aligned for any block split), rows >= pack,
    cols >= 256, then the widest (most lane-dense) cols.
    """
    total = math.prod(shape)

    def score(cols):
        rows = total // cols
        return (
            rows >= pack and rows % pack == 0,
            cols % 256 == 0,
            rows >= pack,
            cols >= 256,
            cols,
        )

    # Natural fold (trailing (H, W, 2)-style dims) as the starting candidate.
    best_cols = math.prod(shape[max(0, len(shape) - 3):])
    best = score(best_cols)

    d = 2
    while d * d <= total:
        if total % d == 0:
            for cols in (d, total // d):
                if cols % 2 == 0:
                    s = score(cols)
                    if s > best:
                        best, best_cols = s, cols
        d += 1
    return total // best_cols, best_cols


def zrelu(x, *, target_block_bytes=None, vmem_limit_bytes=None, donate=False):
    """ZReLU on a tensor with trailing (real, imag) axis, e.g. (N, C, H, W, 2)."""
    assert x.shape[-1] == 2, "last axis must hold (real, imag)"
    orig_shape = x.shape
    itemsize = jnp.dtype(x.dtype).itemsize
    pack = _sublane_pack(x.dtype)

    hw_block, hw_vmem = _hw_block_params()
    if target_block_bytes is None:
        target_block_bytes = hw_block
    if vmem_limit_bytes is None:
        vmem_limit_bytes = hw_vmem

    rows, cols = _fold_to_2d(orig_shape, pack)
    x2 = x.reshape(rows, cols)

    # --- Column block: full width if it fits the per-block budget at minimal
    # row granularity, otherwise the largest multiple of 256 lanes that does
    # (256 keeps (re, im) pairs and lane parity aligned for every block).
    g_r = rows if rows <= pack else pack
    max_cb_bytes = max(256 * itemsize, target_block_bytes // max(g_r, 1))
    if cols * itemsize <= max_cb_bytes:
        cb = cols
    else:
        cb = max(256, (max_cb_bytes // (256 * itemsize)) * 256)
    # Invariants the kernel's partner-select relies on: pairs never straddle a
    # block boundary and lane parity is block-offset invariant.
    assert cb % 2 == 0, "column block must be even (re/im pairs)"
    assert cb == cols or cb % 256 == 0, "split column blocks must be 256-aligned"

    # --- Row block: fill the budget; multiple of the dtype sublane packing
    # (8 f32 / 16 bf16 / 32 int8) or the full extent.
    if rows <= pack:
        rb = rows
    else:
        rb = target_block_bytes // (cb * itemsize)
        rb = rows if rb >= rows else max(pack, (rb // pack) * pack)

    grid = (pl.cdiv(rows, rb), pl.cdiv(cols, cb))

    compiler_kwargs = dict(
        # Both axes parallel so megacore / v7x's two TensorCores can split the
        # grid.  TODO(synk): if an xprof trace shows only one TC active on
        # v7x, switch the row axis to pltpu.CORE_PARALLEL.
        dimension_semantics=("parallel", "parallel"),
    )
    if vmem_limit_bytes is not None:
        compiler_kwargs["vmem_limit_bytes"] = vmem_limit_bytes

    out2 = pl.pallas_call(
        _zrelu_kernel,
        out_shape=jax.ShapeDtypeStruct((rows, cols), x.dtype),
        grid=grid,
        in_specs=[pl.BlockSpec((rb, cb), lambda i, j: (i, j))],
        out_specs=pl.BlockSpec((rb, cb), lambda i, j: (i, j)),
        compiler_params=pltpu.CompilerParams(**compiler_kwargs),
        input_output_aliases={0: 0} if donate else {},
    )(x2)

    return out2.reshape(orig_shape)


def zrelu_ref(x):
    """Pure-JAX reference mirroring the PyTorch module (atan2-based phase)."""
    real = x[..., 0]
    imag = x[..., 1]
    phase = jnp.arctan2(imag, real)
    keep = jnp.logical_and(phase >= 0.0, phase <= jnp.pi / 2)[..., None]
    return jnp.where(keep, x, 0.0)


if __name__ == "__main__":
    zrelu_jit = jax.jit(zrelu)

    # Case 1: standard complex-CNN activation shape (N, C, H, W, 2), f32.
    x1 = jax.random.normal(jax.random.PRNGKey(0), (2, 4, 16, 16, 2), dtype=jnp.float32)
    out1 = jax.block_until_ready(zrelu_jit(x1))
    assert out1.shape == x1.shape and out1.dtype == x1.dtype
    assert jnp.allclose(out1, zrelu_ref(x1), atol=1e-6)

    # Case 2: leading dims with product < 8 (exercises the rows>=8 re-fold).
    x2 = jax.random.normal(jax.random.PRNGKey(1), (1, 2, 16, 16, 2), dtype=jnp.float32)
    out2 = jax.block_until_ready(zrelu_jit(x2))
    assert jnp.allclose(out2, zrelu_ref(x2), atol=1e-6)

    # Case 3: bf16 (exercises sublane-packing-aware row blocks).
    x3 = jax.random.normal(jax.random.PRNGKey(2), (2, 4, 16, 16, 2), dtype=jnp.bfloat16)
    out3 = jax.block_until_ready(zrelu_jit(x3))
    assert jnp.allclose(out3.astype(jnp.float32),
                        zrelu_ref(x3.astype(jnp.float32)), atol=1e-6)

    # Case 4: hand-built all-quadrant check including exact +0.0 (note: -0.0 /
    # NaN signed-zero corner cases are the documented, accepted divergence
    # from the atan2 formulation).
    combos = jnp.array([[r, i] for r in (-1.0, 0.0, 1.0, 2.0)
                        for i in (-1.0, 0.0, 1.0, 2.0)], dtype=jnp.float32)  # (16, 2)
    x4 = jnp.tile(combos, (32, 1)).reshape(8, 64, 2)
    out4 = jax.block_until_ready(zrelu_jit(x4))
    assert jnp.array_equal(out4, zrelu_ref(x4))

    print("KERNEL_OK")
</pallas_src>

<mosaic_0001>
module attributes {stable_mosaic.version = 11 : i64} {
  func.func @_zrelu_kernel(%arg0: i32, %arg1: i32, %arg2: memref<8x512xf32, #tpu.memory_space<vmem>>, %arg3: memref<8x512xf32, #tpu.memory_space<vmem>>) attributes {dimension_semantics = [#tpu.dimension_semantics<parallel>, #tpu.dimension_semantics<parallel>], iteration_bounds = array<i64: 1, 1>, scalar_prefetch = 0 : i64, scratch_operands = 0 : i64, tpu.core_type = #tpu.core_type<tc>, window_params = [{transform_indices = @transform_0, window_bounds = array<i64: 8, 512>}, {transform_indices = @transform_1, window_bounds = array<i64: 8, 512>}]} {
    %c0 = arith.constant 0 : index
    %c0_0 = arith.constant 0 : index
    %0 = vector.load %arg2[%c0, %c0_0] : memref<8x512xf32, #tpu.memory_space<vmem>>, vector<8x512xf32>
    %c1_i32 = arith.constant 1 : i32
    %1 = tpu.dynamic_rotate %0 by %c1_i32 dim 1 : vector<8x512xf32>, i32 -> vector<8x512xf32>
    %c511_i32 = arith.constant 511 : i32
    %2 = tpu.dynamic_rotate %0 by %c511_i32 dim 1 : vector<8x512xf32>, i32 -> vector<8x512xf32>
    %3 = tpu.iota {dimensions = array<i32: 1>} : vector<8x512xi32>
    %c1_i32_1 = arith.constant 1 : i32
    %4 = vector.broadcast %c1_i32_1 : i32 to vector<8x512xi32>
    %5 = arith.andi %3, %4 : vector<8x512xi32>
    %c0_i32 = arith.constant 0 : i32
    %6 = vector.broadcast %c0_i32 : i32 to vector<8x512xi32>
    %7 = arith.cmpi eq, %5, %6 : vector<8x512xi32>
    %8 = arith.select %7, %2, %1 : vector<8x512xi1>, vector<8x512xf32>
    %9 = arith.minimumf %0, %8 : vector<8x512xf32>
    %cst = arith.constant 0.000000e+00 : f32
    %10 = vector.broadcast %cst : f32 to vector<8x512xf32>
    %11 = arith.cmpf oge, %9, %10 : vector<8x512xf32>
    %cst_2 = arith.constant 0.000000e+00 : f32
    %12 = vector.broadcast %cst_2 : f32 to vector<8x512xf32>
    %13 = arith.select %11, %0, %12 : vector<8x512xi1>, vector<8x512xf32>
    %c0_3 = arith.constant 0 : index
    %c0_4 = arith.constant 0 : index
    %14 = vector.load %arg3[%c0_3, %c0_4] : memref<8x512xf32, #tpu.memory_space<vmem>>, vector<8x512xf32>
    tpu.vector_store %arg3[%c0_3, %c0_4], %13 {strides = array<i32>} : memref<8x512xf32, #tpu.memory_space<vmem>>, vector<8x512xf32>,
    return
  }
  func.func @transform_0(%arg0: i32, %arg1: i32) -> (i32, i32) {
    %c0_i32 = arith.constant 0 : i32
    return %arg0, %arg1 : i32, i32
  }
  func.func @transform_1(%arg0: i32, %arg1: i32) -> (i32, i32) {
    %c0_i32 = arith.constant 0 : i32
    return %arg0, %arg1 : i32, i32
  }
}

</mosaic_0001>

<bundles_post_ra>
// kernel: zrelu.1
= control target key start
LH: loop header
LB: loop body
LE: loop exit
PB: predicated region body
PF: predicated region fallthrough
CT: control target
= control target key end

     0   :  { %s77_s10 = smov 1   ;;  %s78_s15 = smov 127   ;;  %v20_v4 = vlaneseq  ;;  %s139_s0 = inlined_call_operand.vmem [shape: f32[8,512], index: 0, kind: input, shape index: {}]   ;;  %s140_s1 = inlined_call_operand.vmem [shape: f32[8,512], index: 1, kind: output, shape index: {}]  }
   0x1   :  { %v10_v0 = vld [vmem:[%s139_s0 + $0x10] sm:$0xff]  ;;  %v8_v1 = vld [vmem:[%s139_s0] sm:$0xff]  ;;  %v11_v2 = vld [vmem:[%s139_s0 + $0x18] sm:$0xff] }
   0x2   :  { %16 = vrot.lane.b32.xlu1 %v10_v0, %s77_s10  ;;  %12 = vrot.lane.b32.xlu0 %v8_v1, %s77_s10  ;;  %v9_v3 = vld [vmem:[%s139_s0 + $0x8] sm:$0xff]  ;;  %v21_v7 = vand.u32 127, %v20_v4 }
   0x4   :  { %v43_v8 = vand.u32 1, %v21_v7  ;;  %v42_v9 = vadd.s32 384, %v21_v7  ;;  %v40_v10 = vadd.s32 128, %v21_v7  ;;  %v41_v11 = vadd.s32 256, %v21_v7 }
   0x5   :  { %vm22_vm0 = vcmp.lt.s32.totalorder %v21_v7, 1  ;;  %vm35_vm1 = vcmp.lt.s32.totalorder %v21_v7, 127 }
   0x6   :  { %18 = vrot.lane.b32.xlu1 %v11_v2, %s77_s10  ;;  %14 = vrot.lane.b32.xlu0 %v9_v3, %s77_s10  ;;  %vm47_vm2 = vcmp.eq.s32.totalorder %v43_v8, 0  ;;  %v46_v14 = vand.u32 1, %v42_v9  ;;  %v44_v15 = vand.u32 1, %v40_v10  ;;  %v45_v16 = vand.u32 1, %v41_v11 }
   0x8   :  { %vm103_vm3 = vcmp.eq.s32.totalorder %v46_v14, 0  ;;  %vm107_vm4 = vcmp.eq.s32.totalorder %v44_v15, 0  ;;  %vm111_vm5 = vcmp.eq.s32.totalorder %v45_v16, 0 }
   0xa   :  { %29 = vrot.lane.b32.xlu1 %v9_v3, %s78_s15  ;;  %27 = vrot.lane.b32.xlu0 %v8_v1, %s78_s15 }
   0xe   :  { %33 = vrot.lane.b32.xlu1 %v11_v2, %s78_s15  ;;  %31 = vrot.lane.b32.xlu0 %v10_v0, %s78_s15 }
  0x74   :  { %v17_v5 = vpop.permute.xlu1 %16  ;;  %v13_v6 = vpop.permute.xlu0 %12 }
  0x78   :  { %v19_v12 = vpop.permute.xlu1 %18  ;;  %v15_v13 = vpop.permute.xlu0 %14 }
  0x79   :  { %v26_v19 = vsel %vm22_vm0, %v19_v12, %v13_v6  ;;  %v23_v26 = vsel %vm22_vm0, %v17_v5, %v19_v12  ;;  %v24_v27 = vsel %vm22_vm0, %v15_v13, %v17_v5  ;;  %v25_v28 = vsel %vm22_vm0, %v13_v6, %v15_v13 }
  0x7c   :  { %v30_v17 = vpop.permute.xlu1 %29  ;;  %v28_v18 = vpop.permute.xlu0 %27 }
  0x7d   :  { %v38_v20 = vsel %vm35_vm1, %v28_v18, %v30_v17 }
  0x7e   :  { %v51_v21 = vsel %vm47_vm2, %v38_v20, %v26_v19 }
  0x7f   :  { %v55_v22 = vmin.f32 %v8_v1, %v51_v21 }
  0x80   :  { %v34_v29 = vpop.permute.xlu1 %33  ;;  %v32_v30 = vpop.permute.xlu0 %31 }
  0x81   :  { %vm59_vm6 = vcmp.ge.f32.partialorder %v55_v22, 0.0  ;;  %v39_v31 = vsel %vm35_vm1, %v34_v29, %v28_v18  ;;  %v36_v32 = vsel %vm35_vm1, %v32_v30, %v34_v29  ;;  %v37_v33 = vsel %vm35_vm1, %v30_v17, %v32_v30 }
  0x82   :  { %v63_v34 = vsel %vm59_vm6, %v8_v1, 0.0  ;;  %v54_v35 = vsel %vm103_vm3, %v39_v31, %v23_v26  ;;  %v52_v36 = vsel %vm107_vm4, %v37_v33, %v25_v28  ;;  %v53_v37 = vsel %vm111_vm5, %v36_v32, %v24_v27 }
  0x83   :  { %67 = vst [vmem:[%s140_s1] sm:$0xff] %v63_v34  ;;  %v58_v38 = vmin.f32 %v11_v2, %v54_v35  ;;  %v56_v39 = vmin.f32 %v9_v3, %v52_v36  ;;  %v57_v40 = vmin.f32 %v10_v0, %v53_v37 }
  0x85   :  { %vm62_vm7 = vcmp.ge.f32.partialorder %v58_v38, 0.0  ;;  %vm60_vm8 = vcmp.ge.f32.partialorder %v56_v39, 0.0  ;;  %vm61_vm9 = vcmp.ge.f32.partialorder %v57_v40, 0.0 }
  0x86   :  { %v66_v41 = vsel %vm62_vm7, %v11_v2, 0.0  ;;  %v64_v42 = vsel %vm60_vm8, %v9_v3, 0.0  ;;  %v65_v43 = vsel %vm61_vm9, %v10_v0, 0.0 }
  0x87   :  { %70 = vst [vmem:[%s140_s1 + $0x18] sm:$0xff] %v66_v41  ;;  %68 = vst [vmem:[%s140_s1 + $0x8] sm:$0xff] %v64_v42 }
  0x88   :  { %69 = vst [vmem:[%s140_s1 + $0x10] sm:$0xff] %v65_v43 }

</bundles_post_ra>
